<compile_context>
chip_gen: v7x
topology: tpu7x:2x2x1
jax: 0.10.0
libtpu: 0.0.40
codegen_flags: <defaults>
</compile_context>

<pallas_src>
import numpy as np
import jax
import jax.numpy as jnp
from jax.experimental import pallas as pl
from jax.experimental.pallas import tpu as pltpu


def _round_up(x, m):
    return ((x + m - 1) // m) * m


# ----------------------------------------------------------------------------
# Pallas kernel: one (block_b, block_n) output tile of  y = (x @ A_in) @ A_outT + b
# ----------------------------------------------------------------------------
def cplinear_kernel(x_ref, a_in_ref, a_outT_ref, b_ref, o_ref, z_ref):
    # Low-rank projection z = x @ A_in is independent of the out-column tile j,
    # so compute it only once per batch tile (j == 0) into a persistent scratch.
    @pl.when(pl.program_id(1) == 0)
    def _():
        z_ref[...] = jnp.dot(x_ref[...], a_in_ref[...],
                             preferred_element_type=jnp.float32)

    # (block_b, order) @ (order, block_n) -- tiny-K matmul, f32 accumulation.
    z = z_ref[...].astype(a_outT_ref.dtype)
    y = jnp.dot(z, a_outT_ref[...], preferred_element_type=jnp.float32)
    # bias broadcast over batch: VPU add, free filler under the MXU.
    o_ref[...] = y + b_ref[...]


# ----------------------------------------------------------------------------
# Wrapper: padding to lane/sublane multiples, 2-D grid, dtype handling
# ----------------------------------------------------------------------------
def cplinear_forward(x, a_in, a_outT, bias, *, block_b=None, block_n=None,
                     compute_dtype=jnp.float32):
    """y = x @ (a_in @ a_outT) + bias, computed as (x @ a_in) @ a_outT + bias."""
    B, in_dim = x.shape
    order, out_dim = a_outT.shape
    assert a_in.shape == (in_dim, order)
    assert bias.shape == (out_dim,)

    # --- tile sizes: lane-dense out tiles (x128), sublane-aligned batch tiles (x8)
    if block_n is None:
        block_n = min(512, _round_up(out_dim, 128))
    block_n = _round_up(block_n, 128)
    out_dim_p = _round_up(out_dim, block_n)

    if block_b is None:
        block_b = min(256, _round_up(B, 8))
    block_b = _round_up(block_b, 8)
    B_p = _round_up(B, block_b)

    # --- pad (zeros never leak: padded rows / cols are sliced off below)
    xp = x if B_p == B else jnp.pad(x, ((0, B_p - B), (0, 0)))
    a_outT_p = a_outT if out_dim_p == out_dim else jnp.pad(
        a_outT, ((0, 0), (0, out_dim_p - out_dim)))
    bias_p = bias if out_dim_p == out_dim else jnp.pad(bias, (0, out_dim_p - out_dim))
    bias2d = bias_p.reshape(1, out_dim_p).astype(jnp.float32)

    # --- compute dtype (bf16 recommended in production; accumulation stays f32)
    xp = xp.astype(compute_dtype)
    a_in_c = a_in.astype(compute_dtype)
    a_outT_c = a_outT_p.astype(compute_dtype)

    nb = B_p // block_b
    nn = out_dim_p // block_n

    itemsize = jnp.dtype(compute_dtype).itemsize
    bytes_accessed = int(xp.size * itemsize + a_in_c.size * itemsize
                         + a_outT_c.size * itemsize + bias2d.size * 4
                         + B_p * out_dim_p * 4)
    cost = pl.CostEstimate(
        flops=2 * B_p * order * (in_dim + out_dim_p),
        transcendentals=0,
        bytes_accessed=bytes_accessed,
    )

    # double-buffered input tiles + output tile + bias + z scratch; keep headroom.
    vmem_need = (2 * itemsize * (block_b * in_dim + in_dim * order + order * block_n)
                 + 2 * 4 * (block_n + block_b * block_n)
                 + 4 * block_b * order)
    vmem_limit = int(min(max(2 * vmem_need, 16 * 1024 * 1024), 64 * 1024 * 1024))

    out_p = pl.pallas_call(
        cplinear_kernel,
        out_shape=jax.ShapeDtypeStruct((B_p, out_dim_p), jnp.float32),
        grid=(nb, nn),
        in_specs=[
            pl.BlockSpec((block_b, in_dim), lambda i, j: (i, 0)),   # x batch tile
            pl.BlockSpec((in_dim, order), lambda i, j: (0, 0)),     # A_in resident
            pl.BlockSpec((order, block_n), lambda i, j: (0, j)),    # A_outT column tile
            pl.BlockSpec((1, block_n), lambda i, j: (0, j)),        # bias column tile
        ],
        out_specs=pl.BlockSpec((block_b, block_n), lambda i, j: (i, j)),
        scratch_shapes=[pltpu.VMEM((block_b, order), jnp.float32)],  # z = x @ A_in
        compiler_params=pltpu.CompilerParams(
            dimension_semantics=("parallel", "arbitrary"),
            vmem_limit_bytes=vmem_limit,
        ),
        cost_estimate=cost,
    )(xp, a_in_c, a_outT_c, bias2d)

    return out_p[:B, :out_dim]


# ----------------------------------------------------------------------------
# Parameter construction + Khatri-Rao column products (cheap glue, plain JAX)
# ----------------------------------------------------------------------------
def make_cp_factors(key, in_modes, out_modes, order):
    """Init mirroring CPLinear.reset_parameters() (normal(0, CONST), zero bias)."""
    modes = list(in_modes) + list(out_modes)
    const = (0.05 / order ** 0.5) ** (1.0 / (len(in_modes) + len(out_modes)))
    factors = []
    for m in modes:
        key, sub = jax.random.split(key)
        factors.append(const * jax.random.normal(sub, (m, order), dtype=jnp.float32))
    bias = jnp.zeros((int(np.prod(out_modes)),), dtype=jnp.float32)
    return factors, bias


def khatri_rao(factor_list):
    """Column-wise Khatri-Rao: result[(i0,i1,...), r] = prod_k f_k[i_k, r]."""
    out = factor_list[0]
    order = out.shape[1]
    for f in factor_list[1:]:
        out = (out[:, None, :] * f[None, :, :]).reshape(-1, order)
    return out


# ----------------------------------------------------------------------------
# Pure-JAX reference replicating the torch code path exactly
# ----------------------------------------------------------------------------
def reference_forward(x, factors, in_modes, out_modes, bias):
    tensor_out = factors[0]
    for f in factors[1:]:
        t_r, t_c = tensor_out.shape
        f_r, f_c = f.shape
        tensor_out = (tensor_out.reshape(t_r, 1, t_c) * f.reshape(1, f_r, f_c)).reshape(
            t_r * f_r, f_c)
    tensor_out = tensor_out.sum(-1)
    W_linear = tensor_out.reshape(int(np.prod(in_modes)), int(np.prod(out_modes)))
    return x @ W_linear + bias


def _run_case(key, in_modes, out_modes, order, batch, block_b, block_n):
    key, kx = jax.random.split(key)
    x = jax.random.normal(kx, (batch, int(np.prod(in_modes))), dtype=jnp.float32)
    factors, bias = make_cp_factors(key, in_modes, out_modes, order)

    n_in = len(in_modes)
    a_in = khatri_rao(factors[:n_in])     # (prod(in_modes), order)
    a_out = khatri_rao(factors[n_in:])    # (prod(out_modes), order)
    a_outT = a_out.T                      # (order, prod(out_modes))

    y_ref = reference_forward(x, factors, in_modes, out_modes, bias)

    # f32 path (tight tolerance).
    y_f32 = cplinear_forward(x, a_in, a_outT, bias, block_b=block_b, block_n=block_n,
                             compute_dtype=jnp.float32)
    y_f32 = jax.block_until_ready(y_f32)
    np.testing.assert_allclose(np.asarray(y_f32), np.asarray(y_ref),
                               rtol=1e-5, atol=1e-5)

    # bf16 compute / f32 accumulation path (production setting, loose tolerance).
    y_bf16 = cplinear_forward(x, a_in, a_outT, bias, block_b=block_b, block_n=block_n,
                              compute_dtype=jnp.bfloat16)
    y_bf16 = jax.block_until_ready(y_bf16)
    np.testing.assert_allclose(np.asarray(y_bf16), np.asarray(y_ref),
                               rtol=5e-2, atol=5e-2)


# ----------------------------------------------------------------------------
if __name__ == "__main__":
    key = jax.random.PRNGKey(0)

    # Case 1: small shapes consistent with the module (in=4*8=32, out=4*4=16).
    _run_case(key, in_modes=(4, 8), out_modes=(4, 4), order=8, batch=16,
              block_b=8, block_n=128)

    # Case 2: exercises multiple output-column tiles (nn > 1) so the z-scratch
    # reuse path (pl.when on program_id(1)==0) is validated end-to-end.
    key, k2 = jax.random.split(key)
    _run_case(k2, in_modes=(8, 16), out_modes=(8, 32), order=16, batch=32,
              block_b=16, block_n=128)

    print("KERNEL_OK")
</pallas_src>

<mosaic_0001>
module attributes {stable_mosaic.version = 11 : i64} {
  func.func @cplinear_kernel(%arg0: i32, %arg1: i32, %arg2: memref<8x32xf32, #tpu.memory_space<vmem>>, %arg3: memref<32x8xf32, #tpu.memory_space<vmem>>, %arg4: memref<8x128xf32, #tpu.memory_space<vmem>>, %arg5: memref<1x128xf32, #tpu.memory_space<vmem>>, %arg6: memref<8x128xf32, #tpu.memory_space<vmem>>, %arg7: memref<8x8xf32, #tpu.memory_space<vmem>>) attributes {dimension_semantics = [#tpu.dimension_semantics<parallel>, #tpu.dimension_semantics<arbitrary>], iteration_bounds = array<i64: 2, 1>, scalar_prefetch = 0 : i64, scratch_operands = 1 : i64, tpu.core_type = #tpu.core_type<tc>, window_params = [{transform_indices = @transform_0, window_bounds = array<i64: 8, 32>}, {pipeline_mode = #tpu.pipeline_mode<synchronous>, transform_indices = @transform_1, window_bounds = array<i64: 32, 8>}, {transform_indices = @transform_2, window_bounds = array<i64: 8, 128>}, {transform_indices = @transform_3, window_bounds = array<i64: 1, 128>}, {transform_indices = @transform_4, window_bounds = array<i64: 8, 128>}]} {
    %c0_i32 = arith.constant 0 : i32
    %0 = arith.cmpi eq, %arg1, %c0_i32 : i32
    %1 = arith.extui %0 : i1 to i32
    %c0_i32_0 = arith.constant 0 : i32
    %2 = arith.cmpi ne, %1, %c0_i32_0 : i32
    scf.if %2 {
      %c0_8 = arith.constant 0 : index
      %c0_9 = arith.constant 0 : index
      %10 = vector.load %arg2[%c0_8, %c0_9] : memref<8x32xf32, #tpu.memory_space<vmem>>, vector<8x32xf32>
      %c0_10 = arith.constant 0 : index
      %c0_11 = arith.constant 0 : index
      %11 = vector.load %arg3[%c0_10, %c0_11] : memref<32x8xf32, #tpu.memory_space<vmem>>, vector<32x8xf32>
      %cst_12 = arith.constant dense<0.000000e+00> : vector<8x8xf32>
      %12 = tpu.matmul %10, %11, %cst_12 {dimension_numbers = #tpu.dot_dimension_numbers<[1], [0], [0], [1], [0, 0, 1, 1], [], []>} : vector<8x32xf32>, vector<32x8xf32>, vector<8x8xf32> -> vector<8x8xf32>
      %c0_13 = arith.constant 0 : index
      %c0_14 = arith.constant 0 : index
      %13 = vector.load %arg7[%c0_13, %c0_14] : memref<8x8xf32, #tpu.memory_space<vmem>>, vector<8x8xf32>
      tpu.vector_store %arg7[%c0_13, %c0_14], %12 {strides = array<i32>} : memref<8x8xf32, #tpu.memory_space<vmem>>, vector<8x8xf32>,
    } else {
    }
    %c0 = arith.constant 0 : index
    %c0_1 = arith.constant 0 : index
    %3 = vector.load %arg7[%c0, %c0_1] : memref<8x8xf32, #tpu.memory_space<vmem>>, vector<8x8xf32>
    %c0_2 = arith.constant 0 : index
    %c0_3 = arith.constant 0 : index
    %4 = vector.load %arg4[%c0_2, %c0_3] : memref<8x128xf32, #tpu.memory_space<vmem>>, vector<8x128xf32>
    %cst = arith.constant dense<0.000000e+00> : vector<8x128xf32>
    %5 = tpu.matmul %3, %4, %cst {dimension_numbers = #tpu.dot_dimension_numbers<[1], [0], [0], [1], [0, 0, 1, 1], [], []>} : vector<8x8xf32>, vector<8x128xf32>, vector<8x128xf32> -> vector<8x128xf32>
    %c0_4 = arith.constant 0 : index
    %c0_5 = arith.constant 0 : index
    %6 = vector.load %arg5[%c0_4, %c0_5] : memref<1x128xf32, #tpu.memory_space<vmem>>, vector<1x128xf32>
    %7 = vector.broadcast %6 : vector<1x128xf32> to vector<8x128xf32>
    %8 = arith.addf %5, %7 : vector<8x128xf32>
    %c0_6 = arith.constant 0 : index
    %c0_7 = arith.constant 0 : index
    %9 = vector.load %arg6[%c0_6, %c0_7] : memref<8x128xf32, #tpu.memory_space<vmem>>, vector<8x128xf32>
    tpu.vector_store %arg6[%c0_6, %c0_7], %8 {strides = array<i32>} : memref<8x128xf32, #tpu.memory_space<vmem>>, vector<8x128xf32>,
    return
  }
  func.func @transform_0(%arg0: i32, %arg1: i32) -> (i32, i32) {
    %c0_i32 = arith.constant 0 : i32
    %c0_i32_0 = arith.constant 0 : i32
    return %arg0, %c0_i32 : i32, i32
  }
  func.func @transform_1(%arg0: i32, %arg1: i32) -> (i32, i32) {
    %c0_i32 = arith.constant 0 : i32
    %c0_i32_0 = arith.constant 0 : i32
    %c0_i32_1 = arith.constant 0 : i32
    return %c0_i32, %c0_i32_0 : i32, i32
  }
  func.func @transform_2(%arg0: i32, %arg1: i32) -> (i32, i32) {
    %c0_i32 = arith.constant 0 : i32
    %c0_i32_0 = arith.constant 0 : i32
    return %c0_i32, %arg1 : i32, i32
  }
  func.func @transform_3(%arg0: i32, %arg1: i32) -> (i32, i32) {
    %c0_i32 = arith.constant 0 : i32
    %c0_i32_0 = arith.constant 0 : i32
    return %c0_i32, %arg1 : i32, i32
  }
  func.func @transform_4(%arg0: i32, %arg1: i32) -> (i32, i32) {
    %c0_i32 = arith.constant 0 : i32
    return %arg0, %arg1 : i32, i32
  }
}

</mosaic_0001>

<bundles_post_ra>
// kernel: tpu_custom_call.1
= control target key start
LH: loop header
LB: loop body
LE: loop exit
PB: predicated region body
PF: predicated region fallthrough
CT: control target
= control target key end

     0   :  { %9 = vsyncpa [#allocation4], 0  ;;  %s859_s0 = inlined_call_operand.vmem [shape: f32[16,32], index: 0, kind: input, shape index: {}]   ;;  %s860_s1 = inlined_call_operand.vmem [shape: f32[32,8], index: 1, kind: input, shape index: {}]   ;;  %s861_s2 = inlined_call_operand.vmem [shape: f32[8,128], index: 2, kind: input, shape index: {}]   ;;  %s862_s3 = inlined_call_operand.vmem [shape: f32[1,128], index: 3, kind: input, shape index: {}]   ;;  %s863_s4 = inlined_call_operand.hbm [shape: f32[16,128], index: 4, kind: output, shape index: {}]  }
   0x1   :  { %11 = vsyncpa [#allocation4 + $0x1], 0  ;;  %s729_s15 = smov 0   ;;  %s731_s16 = smov 0  }
   0x2   :  { %s733_s17 = smov 0   ;;  %s735_s18 = smov 0  }
   0x3   :  { %s737_s19 = smov 0   ;;  %s739_s20 = smov 0  }
   0x4 LB: > { %s517_s21 = sadd.s32 4294967295, %s698_s20   ;;  %s518_s22 = sadd.s32 4294967294, %s698_s20   ;;  %s698_s20 = sphi %s739_s20, %s17_s20   ;;  %s694_s19 = sphi %s737_s19, %s870_s19   ;;  %s690_s18 = sphi %s735_s18, %s869_s18   ;;  %s686_s17 = sphi %s733_s17, %s868_s17   ;;  %s682_s16 = sphi %s731_s16, %s867_s16   ;;  %s678_s15 = sphi %s729_s15, %s866_s15  }
   0x5   : > { %s29_s23 = sadd.s32 1, %s694_s19  ;;  %s137_s24 = sadd.s32 1, %s686_s17 }
   0x6   : > { %p31_p0 = scmp.ge.s32.totalorder %s29_s23, 2  ;;  %p147_p1 = scmp.ne.s32.totalorder %s686_s17, %s682_s16 }
   0x7   : > { %p148_p2 = scmp.eq.s32.totalorder %s517_s21, 1  ;;  %p153_p3 = scmp.ne.s32.totalorder %s682_s16, %s678_s15 }
   0x8   : > { %s872_s23 = smov (%p31_p0, %s29_s23), 0  ;;  %p154_p5 = scmp.eq.s32.totalorder %s518_s22, 1 }
   0x9   : > { %p769_p4 = por %p148_p2, %p147_p1  ;;  %s132_s26 = ssub.s32 %s694_s19, %s872_s23 }
   0xa   : > { %p523_p6 = scmp.ge.s32.totalorder %s698_s20, 1  ;;  %p135_p7 = scmp.eq.s32.totalorder %s132_s26, 0 }
   0xb   : > { %p776_p8 = por %p154_p5, %p153_p3  ;;  %p195_p9 = scmp.lt.s32.totalorder %s698_s20, 3 }
   0xc   : > { %s782_s28 = scalar_select %p135_p7, %s686_s17, %s137_s24  }
   0xd   : > { %p196_p10 = pnand %p523_p6, %p195_p9 }
   0xe   : > { %v243_v0 = vld [vmem:[%s860_s1] sm:$0xff] (!%p196_p10)  ;;  %v244_v1 = vld [vmem:[%s860_s1 + $0x8] sm:$0xff] (!%p196_p10)  ;;  %v245_v2 = vld [vmem:[%s860_s1 + $0x10] sm:$0xff] (!%p196_p10)  ;;  %v700_v3 = vmov (!%p196_p10), 0.0|0.0   ;;  %vm701_vm0 = vmmov (!%p196_p10), 0   ;;  %v702_v6 = vmov (!%p196_p10), 0.0  }
   0xf   : > { %199 = sbr.rel (%p196_p10) target bundleno = 475 (0x1db), region = 36  ;;  %556 = vmatprep.subr.bf16.mxu0 (!%p196_p10), %v700_v3  ;;  %v557_v4 = vpack.c.bf16 (!%p196_p10), %v244_v1, %v243_v0  ;;  %v246_v5 = vld [vmem:[%s860_s1 + $0x18] sm:$0xff] (!%p196_p10)  ;;  %548 = vmatprep.mubr.msk.f32.mxu0 (!%p196_p10), %vm701_vm0, %v702_v6  ;;  %p227_p11 = scmp.lt.s32.totalorder (!%p196_p10), %s690_s18, 1  ;;  %vm247_vm1 = vcmask (!%p196_p10), 261120   ;;  %v324_v9 = vld [vmem:[%s861_s2] sm:$0xff] (!%p196_p10)  ;;  %vm321_vm2 = vcmask (!%p196_p10), 64512  }
  0x10   : > { %551 = vmatprep.subr.mxu1 (!%p196_p10), %v702_v6  ;;  %553 = vmatprep.mubr.msk.f32.mxu1 (!%p196_p10), %vm701_vm0, %v702_v6  ;;  %v560_v7 = vpack.c.bf16 (!%p196_p10), %v246_v5, %v245_v2  ;;  %s224_s26 = sand.u32 (!%p196_p10), 1, %s682_s16   ;;  %v527_v13 = vld [vmem:[%s862_s3] ss:$0 sm:$0xff] (!%p196_p10)  ;;  %s530_s6 = sshll.u32 (!%p196_p10), %s690_s18, 7 }
  0x11   : > { %558 = vmatpush3.bf16.msra.mxu0 (!%p196_p10), %v557_v4  ;;  %552 = vmatpush3.msra.mxu1 (!%p196_p10), %v324_v9  ;;  %s524_s29 = sshll.u32 (!%p196_p10), %s224_s26, 3 }
  0x12   : > { %559 = vmatprep.subr.bf16.mxu0 (!%p196_p10), %v700_v3  ;;  %s226_s7 = scalar_lea.vmem (!%p196_p10), [#allocation3], %s524_s29 }
  0x13   : > { %s422_s8 = sshll.u32 (!%p196_p10), %s226_s7, 4  ;;  %s814_s8 = int_to_ptr.vmem [resolvable:$true] %s422_s8 }
  0x14   : > { %s620_s13 = scalar_lea.vmem (!%p196_p10), %s814_s8, 128 }
  0x15   : > { %561 = vmatpush3.bf16.msra.mxu0 (!%p196_p10), %v560_v7  ;;  %p621_p12 = scmp.ne.s32.totalorder (!%p196_p10), %s814_s8, %s620_s13 }
  0x16   : > { %s228_s11 = scalar_select %p227_p11, %s690_s18, 1 }
  0x17   : > { %p622_p13 = pnand %p621_p12, %p769_p4  ;;  %s703_s18 = smov [#allocation3]  }
  0x18   : > { %s525_s12 = sshll.u32 %s228_s11, 3  ;;  %s812_s11 = scalar_lea.hbm %s863_s4, %s530_s6 }
  0x19   : > { %s230_s21 = scalar_lea.vmem %s859_s0, %s525_s12  ;;  %s408_s12 = scalar_lea.sflag [#allocation4], %s224_s26 }
  0x1a   : > { %v242_v8 = vld [vmem:[%s230_s21] sm:$0xff]  ;;  %p623_p0 = pneg %p622_p13  ;;  %s624_s14 = sshll.u32 %s703_s18, 4  ;;  %s625_s14 = int_to_ptr.vmem [resolvable:$false] %s624_s14 }
  0x1b   : > { %549 = vmatmul.mubr.msk.f32.vlgmr.msra.gmra.mrb[0].mxu0 %vm247_vm1, %v242_v8  ;;  %s626_s21 = scalar_lea.vmem %s625_s14, 256  ;;  %p627_p1 = scmp.lt.s32.totalorder %s814_s8, %s625_s14 }
  0x1c   : > { %p628_p2 = scmp.lt.s32.totalorder %s626_s21, %s620_s13 }
  0x1e   : > { %p629_p3 = por %p628_p2, %p627_p1 }
  0x20   : > { %p630_p5 = pnand %p629_p3, %p623_p0 }
  0xee   : > { %v317_v10 = vpop.f32.mrb[0].mxu0 }
  0xef   : > { %322 = vst.msk [vmem:[#allocation2] sm:$0xff] %vm321_vm2, %v317_v10  ;;  %v550_v11 = vpop.f32.mrb[1].mxu0 }
  0xf6   : > { %v323_v12 = vld [vmem:[#allocation2] sm:$0xff] }
  0xf7   : > { %554 = vmatmul.mubr.msk.f32.vlgmr.msra.gmra.mrb[0].mxu1 %vm321_vm2, %v323_v12 }
 0x1ca   : > { %v402_v14 = vpop.f32.mrb[0].mxu1 }
 0x1cb   : > { %v403_v15 = vadd.f32 %v527_v13, %v402_v14  ;;  %v555_v16 = vpop.f32.mrb[1].mxu1 }
 0x1cd   : > { %406 = vst [vmem:[%s226_s7] sm:$0xff] %v403_v15 }
 0x1ce   : > { %633 = shalt.err (!%p630_p5)
}
 0x1cf   : > { %s634_s22 = scalar_lea.hbm %s812_s11, 128  ;;  %s638_s29 = scalar_lea.hbm %s863_s4, 256 }
 0x1d0   : > { %p635_p6 = scmp.ne.s32.totalorder %s812_s11, %s634_s22  ;;  %p639_p10 = scmp.lt.u32.totalorder %s812_s11, %s863_s4 }
 0x1d1   : > { %p640_p11 = scmp.lt.u32.totalorder %s638_s29, %s634_s22  ;;  %p642_p13 = scmp.lt.u32.totalorder %s634_s22, %s812_s11 }
 0x1d2   : > { %p636_p7 = pnand %p635_p6, %p769_p4 }
 0x1d3   : > { %p641_p12 = por %p640_p11, %p639_p10 }
 0x1d4   : > { %p637_p9 = pneg %p636_p7 }
 0x1d5   : > { %p643_p0 = por %p642_p13, %p641_p12 }
 0x1d7   : > { %p644_p1 = pnand %p643_p0, %p637_p9 }
 0x1d9   : > { %647 = shalt.err (!%p644_p1)
}
 0x1da   : > { %562 = dma.vmem_to_hbm [thread:$0]  (%p769_p4), %s814_s8, 128, %s812_s11, %s408_s12  }
 0x1db PF: > { %p568_p2 = scmp.ge.s32.totalorder %s698_s20, 2  ;;  %s434_s6 = sand.u32 1, %s678_s15  }
 0x1dc   : > { %s435_s7 = scalar_lea.sflag [#allocation4], %s434_s6 }
 0x1dd   : > { %p565_p3 = pnand %p568_p2, %p776_p8 }
 0x1df   : > { %673 = dma.done.wait (!%p565_p3), %s435_s7, 128  }
 0x1e0   : > { %675 = vsyncadd (!%p565_p3), %s435_s7, 4294967168  ;;  %s17_s20 = sadd.s32 1, %s698_s20   ;;  %s866_s15 = smov %s682_s16 }
 0x1e1   : > { %p14_p5 = scmp.ge.s32.totalorder %s17_s20, 4   ;;  %s867_s16 = smov %s686_s17 }
 0x1e2   : > { %s868_s17 = smov %s782_s28  ;;  %s869_s18 = smov %s694_s19 }
 0x1e3   : > { %s870_s19 = smov %s872_s23  ;;  %16 = sbr.rel (!%p14_p5) target bundleno = 4 (0x4), region = 81 }
 0x1ea   :  { %440 = vsyncpa [#allocation4], 1 }
 0x1eb   :  { %442 = vsyncpa [#allocation4 + $0x1], 1 }

</bundles_post_ra>
